<compile_context>
chip_gen: v6e
topology: v6e:2x2x1
jax: 0.10.0
libtpu: 0.0.40
codegen_flags: <defaults>
</compile_context>

<pallas_src>
import jax
import jax.numpy as jnp
from jax.experimental import pallas as pl
from jax.experimental.pallas import tpu as pltpu


# ----------------------------------------------------------------------------
# Kernel
# ----------------------------------------------------------------------------
def se_basic_block_kernel(x_ref, w1_ref, b1_ref, w2_ref, b2_ref,
                          wse1_ref, wse2_ref, o_ref):
    """One grid step: a (TB, C, L) batch tile, full fused block forward."""
    TB, C, L = x_ref.shape
    inv_l = 1.0 / L

    w1 = w1_ref[...]            # (C, C)  conv1 weight with bn1 folded in
    b1 = b1_ref[...]            # (C, 1)  folded bias (f32)
    w2 = w2_ref[...]            # (C, C)  conv2 weight with bn2 folded in
    b2 = b2_ref[...]            # (C, 1)  folded bias (f32)

    h2_slabs = []
    pooled_cols = []
    # Static (unrolled) loop over the small batch tile: each iteration is a
    # pair of full lane-dense (C,C)x(C,L) MXU matmuls -- no 3-D transposes.
    for b in range(TB):
        xb = x_ref[b]                                                   # (C, L)
        h1 = jnp.dot(w1, xb, preferred_element_type=jnp.float32) + b1   # (C, L) f32
        h1 = jnp.maximum(h1, 0.0)
        h2 = jnp.dot(w2, h1, preferred_element_type=jnp.float32) + b2   # (C, L) f32
        h2_slabs.append(h2)
        # explicit f32 sum with the true L as divisor (not jnp.mean)
        pooled_cols.append(jnp.sum(h2, axis=-1, keepdims=True) * inv_l)  # (C, 1)

    # SE excitation, batched across the tile: (C, TB) columns.
    pooled = pooled_cols[0] if TB == 1 else jnp.concatenate(pooled_cols, axis=1)
    e = jnp.dot(wse1_ref[...], pooled, preferred_element_type=jnp.float32)  # (H, TB)
    e = jnp.maximum(e, 0.0)
    gate = jax.nn.sigmoid(
        jnp.dot(wse2_ref[...], e, preferred_element_type=jnp.float32))      # (C, TB)

    # Scale + residual + relu, written back in the source dtype (lane-dense L).
    for b in range(TB):
        g = gate[:, b:b + 1]                                   # (C, 1), static slice
        res = x_ref[b].astype(jnp.float32)
        out = h2_slabs[b] * g + res
        o_ref[b] = jnp.maximum(out, 0.0).astype(o_ref.dtype)


# ----------------------------------------------------------------------------
# Wrapper
# ----------------------------------------------------------------------------
def _fold_conv_bn(conv_w, conv_b, gamma, beta, mean, var, eps=1e-5):
    """Fold eval-mode BatchNorm1d into a 1x1 Conv1d (weight (C_out,C_in,1))."""
    scale = gamma / jnp.sqrt(var + eps)
    w = conv_w[:, :, 0] * scale[:, None]
    b = (conv_b - mean) * scale + beta
    return w, b


def _pick_tb(B, C, L, itemsize, vmem_budget=40 << 20):
    """Largest batch tile that divides B, fits the VMEM budget, and (when
    possible) leaves >=2 grid steps so both v7x TensorCores get work."""
    best = 1
    for tb in range(1, B + 1):
        if B % tb:
            continue
        # double-buffered in/out blocks + ~3 f32 slab temporaries in the body
        per_step = tb * C * L * (4 * itemsize + 12)
        if per_step > vmem_budget:
            continue
        if B // tb >= 2 or B == 1:
            best = tb
    return best


def se_basic_block(x, conv1_w, conv1_b, bn1, conv2_w, conv2_b, bn2,
                   se_w1, se_w2, *, eps=1e-5, tb=None):
    """x: (B, C, L). conv*_w: (C, C, 1). conv*_b: (C,).
    bn* = (gamma, beta, running_mean, running_var), each (C,).
    se_w1: (C//r, C), se_w2: (C, C//r)."""
    B, C, L = x.shape
    H = se_w1.shape[0]
    dt = x.dtype

    # Fold BN into the 1x1 convs (cheap one-time parameter preprocessing).
    w1f, b1f = _fold_conv_bn(conv1_w, conv1_b, *bn1, eps=eps)
    w2f, b2f = _fold_conv_bn(conv2_w, conv2_b, *bn2, eps=eps)
    w1f = w1f.astype(dt)
    w2f = w2f.astype(dt)
    b1f = b1f.astype(jnp.float32).reshape(C, 1)
    b2f = b2f.astype(jnp.float32).reshape(C, 1)
    se_w1 = se_w1.astype(dt)
    se_w2 = se_w2.astype(dt)

    if tb is None:
        tb = _pick_tb(B, C, L, x.dtype.itemsize)
    assert B % tb == 0, f"batch tile {tb} must divide B={B}"
    grid = (B // tb,)

    slab = tb * C * L
    vmem_needed = (4 * slab * x.dtype.itemsize   # double-buffered in/out blocks
                   + 3 * slab * 4                # f32 temporaries (h1/h2/out)
                   + 8 * C * C * 4               # weights (generous)
                   + (2 << 20))                  # slack
    vmem_limit = int(min(64 << 20, max(32 << 20, vmem_needed)))

    return pl.pallas_call(
        se_basic_block_kernel,
        out_shape=jax.ShapeDtypeStruct((B, C, L), dt),
        grid_spec=pltpu.PrefetchScalarGridSpec(
            num_scalar_prefetch=0,
            grid=grid,
            in_specs=[
                pl.BlockSpec((tb, C, L), lambda b: (b, 0, 0)),  # x batch tile
                pl.BlockSpec((C, C), lambda b: (0, 0)),         # folded conv1 weight
                pl.BlockSpec((C, 1), lambda b: (0, 0)),         # folded conv1 bias
                pl.BlockSpec((C, C), lambda b: (0, 0)),         # folded conv2 weight
                pl.BlockSpec((C, 1), lambda b: (0, 0)),         # folded conv2 bias
                pl.BlockSpec((H, C), lambda b: (0, 0)),         # SE fc1 weight
                pl.BlockSpec((C, H), lambda b: (0, 0)),         # SE fc2 weight
            ],
            out_specs=pl.BlockSpec((tb, C, L), lambda b: (b, 0, 0)),
        ),
        compiler_params=pltpu.CompilerParams(
            dimension_semantics=("parallel",),
            vmem_limit_bytes=vmem_limit),
    )(x, w1f, b1f, w2f, b2f, se_w1, se_w2)


# ----------------------------------------------------------------------------
# Plain-JAX reference (matches the PyTorch forward, eval-mode BN)
# ----------------------------------------------------------------------------
def se_basic_block_ref(x, conv1_w, conv1_b, bn1, conv2_w, conv2_b, bn2,
                       se_w1, se_w2, eps=1e-5):
    def bn(y, p):
        g, b, m, v = p
        s = g / jnp.sqrt(v + eps)
        return (y - m[None, :, None]) * s[None, :, None] + b[None, :, None]

    out = jnp.einsum('oc,bcl->bol', conv1_w[:, :, 0], x) + conv1_b[None, :, None]
    out = jnp.maximum(bn(out, bn1), 0.0)
    out = jnp.einsum('oc,bcl->bol', conv2_w[:, :, 0], out) + conv2_b[None, :, None]
    out = bn(out, bn2)
    y = jnp.mean(out, axis=-1)                    # (B, C)
    y = jnp.maximum(y @ se_w1.T, 0.0)             # (B, H)
    y = jax.nn.sigmoid(y @ se_w2.T)               # (B, C)
    out = out * y[:, :, None]
    return jnp.maximum(out + x, 0.0)


if __name__ == "__main__":
    B, C, L = 2, 128, 128
    reduction = 16
    H = C // reduction

    key = jax.random.PRNGKey(0)
    ks = jax.random.split(key, 16)

    x = jax.random.normal(ks[0], (B, C, L), dtype=jnp.float32)

    conv1_w = jax.random.normal(ks[1], (C, C, 1), jnp.float32) * (1.0 / jnp.sqrt(C))
    conv1_b = jax.random.normal(ks[2], (C,), jnp.float32) * 0.1
    bn1 = (jax.random.uniform(ks[3], (C,), jnp.float32, 0.5, 1.5),   # gamma
           jax.random.normal(ks[4], (C,), jnp.float32) * 0.1,        # beta
           jax.random.normal(ks[5], (C,), jnp.float32) * 0.1,        # running_mean
           jax.random.uniform(ks[6], (C,), jnp.float32, 0.5, 1.5))   # running_var

    conv2_w = jax.random.normal(ks[7], (C, C, 1), jnp.float32) * (1.0 / jnp.sqrt(C))
    conv2_b = jax.random.normal(ks[8], (C,), jnp.float32) * 0.1
    bn2 = (jax.random.uniform(ks[9], (C,), jnp.float32, 0.5, 1.5),
           jax.random.normal(ks[10], (C,), jnp.float32) * 0.1,
           jax.random.normal(ks[11], (C,), jnp.float32) * 0.1,
           jax.random.uniform(ks[12], (C,), jnp.float32, 0.5, 1.5))

    se_w1 = jax.random.normal(ks[13], (H, C), jnp.float32) * (1.0 / jnp.sqrt(C))
    se_w2 = jax.random.normal(ks[14], (C, H), jnp.float32) * (1.0 / jnp.sqrt(H))

    out = jax.block_until_ready(
        se_basic_block(x, conv1_w, conv1_b, bn1, conv2_w, conv2_b, bn2,
                       se_w1, se_w2))
    ref = se_basic_block_ref(x, conv1_w, conv1_b, bn1, conv2_w, conv2_b, bn2,
                             se_w1, se_w2)

    assert out.shape == (B, C, L)
    assert jnp.allclose(out, ref, atol=1e-3, rtol=1e-3), \
        float(jnp.max(jnp.abs(out - ref)))
    print("KERNEL_OK")
</pallas_src>

<mosaic_0001>
module attributes {stable_mosaic.version = 11 : i64} {
  func.func @se_basic_block_kernel(%arg0: i32, %arg1: memref<1x128x128xf32, #tpu.memory_space<vmem>>, %arg2: memref<128x128xf32, #tpu.memory_space<vmem>>, %arg3: memref<128x1xf32, #tpu.memory_space<vmem>>, %arg4: memref<128x128xf32, #tpu.memory_space<vmem>>, %arg5: memref<128x1xf32, #tpu.memory_space<vmem>>, %arg6: memref<8x128xf32, #tpu.memory_space<vmem>>, %arg7: memref<128x8xf32, #tpu.memory_space<vmem>>, %arg8: memref<1x128x128xf32, #tpu.memory_space<vmem>>) attributes {dimension_semantics = [#tpu.dimension_semantics<parallel>], iteration_bounds = array<i64: 2>, scalar_prefetch = 0 : i64, scratch_operands = 0 : i64, tpu.core_type = #tpu.core_type<tc>, window_params = [{transform_indices = @transform_0, window_bounds = array<i64: 1, 128, 128>}, {pipeline_mode = #tpu.pipeline_mode<synchronous>, transform_indices = @transform_1, window_bounds = array<i64: 128, 128>}, {pipeline_mode = #tpu.pipeline_mode<synchronous>, transform_indices = @transform_2, window_bounds = array<i64: 128, 1>}, {pipeline_mode = #tpu.pipeline_mode<synchronous>, transform_indices = @transform_3, window_bounds = array<i64: 128, 128>}, {pipeline_mode = #tpu.pipeline_mode<synchronous>, transform_indices = @transform_4, window_bounds = array<i64: 128, 1>}, {pipeline_mode = #tpu.pipeline_mode<synchronous>, transform_indices = @transform_5, window_bounds = array<i64: 8, 128>}, {pipeline_mode = #tpu.pipeline_mode<synchronous>, transform_indices = @transform_6, window_bounds = array<i64: 128, 8>}, {transform_indices = @transform_7, window_bounds = array<i64: 1, 128, 128>}]} {
    %c0 = arith.constant 0 : index
    %c0_0 = arith.constant 0 : index
    %0 = vector.load %arg2[%c0, %c0_0] : memref<128x128xf32, #tpu.memory_space<vmem>>, vector<128x128xf32>
    %c0_1 = arith.constant 0 : index
    %c0_2 = arith.constant 0 : index
    %1 = vector.load %arg3[%c0_1, %c0_2] : memref<128x1xf32, #tpu.memory_space<vmem>>, vector<128x1xf32>
    %c0_3 = arith.constant 0 : index
    %c0_4 = arith.constant 0 : index
    %2 = vector.load %arg4[%c0_3, %c0_4] : memref<128x128xf32, #tpu.memory_space<vmem>>, vector<128x128xf32>
    %c0_5 = arith.constant 0 : index
    %c0_6 = arith.constant 0 : index
    %3 = vector.load %arg5[%c0_5, %c0_6] : memref<128x1xf32, #tpu.memory_space<vmem>>, vector<128x1xf32>
    %c0_7 = arith.constant 0 : index
    %c0_8 = arith.constant 0 : index
    %c0_9 = arith.constant 0 : index
    %4 = vector.load %arg1[%c0_7, %c0_8, %c0_9] : memref<1x128x128xf32, #tpu.memory_space<vmem>>, vector<1x128x128xf32>
    %5 = vector.shape_cast %4 : vector<1x128x128xf32> to vector<128x128xf32>
    %cst = arith.constant dense<0.000000e+00> : vector<128x128xf32>
    %6 = tpu.matmul %0, %5, %cst {dimension_numbers = #tpu.dot_dimension_numbers<[1], [0], [0], [1], [0, 0, 1, 1], [], []>} : vector<128x128xf32>, vector<128x128xf32>, vector<128x128xf32> -> vector<128x128xf32>
    %7 = vector.broadcast %1 : vector<128x1xf32> to vector<128x128xf32>
    %8 = arith.addf %6, %7 : vector<128x128xf32>
    %cst_10 = arith.constant 0.000000e+00 : f32
    %9 = vector.broadcast %cst_10 : f32 to vector<128x128xf32>
    %10 = arith.maximumf %8, %9 : vector<128x128xf32>
    %cst_11 = arith.constant dense<0.000000e+00> : vector<128x128xf32>
    %11 = tpu.matmul %2, %10, %cst_11 {dimension_numbers = #tpu.dot_dimension_numbers<[1], [0], [0], [1], [0, 0, 1, 1], [], []>} : vector<128x128xf32>, vector<128x128xf32>, vector<128x128xf32> -> vector<128x128xf32>
    %12 = vector.broadcast %3 : vector<128x1xf32> to vector<128x128xf32>
    %13 = arith.addf %11, %12 : vector<128x128xf32>
    %cst_12 = arith.constant dense<0.000000e+00> : vector<128xf32>
    %14 = vector.multi_reduction <add>, %13, %cst_12 [1] : vector<128x128xf32> to vector<128xf32>
    %15 = vector.shape_cast %14 : vector<128xf32> to vector<128x1xf32>
    %cst_13 = arith.constant 7.812500e-03 : f32
    %16 = vector.broadcast %cst_13 : f32 to vector<128x1xf32>
    %17 = arith.mulf %15, %16 : vector<128x1xf32>
    %c0_14 = arith.constant 0 : index
    %c0_15 = arith.constant 0 : index
    %18 = vector.load %arg6[%c0_14, %c0_15] : memref<8x128xf32, #tpu.memory_space<vmem>>, vector<8x128xf32>
    %cst_16 = arith.constant dense<0.000000e+00> : vector<8x1xf32>
    %19 = tpu.matmul %18, %17, %cst_16 {dimension_numbers = #tpu.dot_dimension_numbers<[1], [0], [0], [1], [0, 0, 1, 1], [], []>} : vector<8x128xf32>, vector<128x1xf32>, vector<8x1xf32> -> vector<8x1xf32>
    %cst_17 = arith.constant 0.000000e+00 : f32
    %20 = vector.broadcast %cst_17 : f32 to vector<8x1xf32>
    %21 = arith.maximumf %19, %20 : vector<8x1xf32>
    %c0_18 = arith.constant 0 : index
    %c0_19 = arith.constant 0 : index
    %22 = vector.load %arg7[%c0_18, %c0_19] : memref<128x8xf32, #tpu.memory_space<vmem>>, vector<128x8xf32>
    %cst_20 = arith.constant dense<0.000000e+00> : vector<128x1xf32>
    %23 = tpu.matmul %22, %21, %cst_20 {dimension_numbers = #tpu.dot_dimension_numbers<[1], [0], [0], [1], [0, 0, 1, 1], [], []>} : vector<128x8xf32>, vector<8x1xf32>, vector<128x1xf32> -> vector<128x1xf32>
    %24 = arith.negf %23 : vector<128x1xf32>
    %25 = math.exp %24 : vector<128x1xf32>
    %cst_21 = arith.constant 1.000000e+00 : f32
    %26 = vector.broadcast %cst_21 : f32 to vector<128x1xf32>
    %27 = arith.addf %26, %25 : vector<128x1xf32>
    %28 = arith.divf %26, %27 : vector<128x1xf32>
    %c0_22 = arith.constant 0 : index
    %c0_23 = arith.constant 0 : index
    %c0_24 = arith.constant 0 : index
    %29 = vector.load %arg1[%c0_22, %c0_23, %c0_24] : memref<1x128x128xf32, #tpu.memory_space<vmem>>, vector<1x128x128xf32>
    %30 = vector.shape_cast %29 : vector<1x128x128xf32> to vector<128x128xf32>
    %31 = vector.broadcast %28 : vector<128x1xf32> to vector<128x128xf32>
    %32 = arith.mulf %13, %31 : vector<128x128xf32>
    %33 = arith.addf %32, %30 : vector<128x128xf32>
    %cst_25 = arith.constant 0.000000e+00 : f32
    %34 = vector.broadcast %cst_25 : f32 to vector<128x128xf32>
    %35 = arith.maximumf %33, %34 : vector<128x128xf32>
    %c0_26 = arith.constant 0 : index
    %c0_27 = arith.constant 0 : index
    %c0_28 = arith.constant 0 : index
    %36 = vector.load %arg8[%c0_26, %c0_27, %c0_28] : memref<1x128x128xf32, #tpu.memory_space<vmem>>, vector<1x128x128xf32>
    %37 = vector.shape_cast %36 : vector<1x128x128xf32> to vector<128x128xf32>
    %38 = vector.shape_cast %35 : vector<128x128xf32> to vector<1x128x128xf32>
    tpu.vector_store %arg8[%c0_26, %c0_27, %c0_28], %38 {strides = array<i32>} : memref<1x128x128xf32, #tpu.memory_space<vmem>>, vector<1x128x128xf32>,
    return
  }
  func.func @transform_0(%arg0: i32) -> (i32, i32, i32) {
    %c0_i32 = arith.constant 0 : i32
    %c0_i32_0 = arith.constant 0 : i32
    %c0_i32_1 = arith.constant 0 : i32
    return %arg0, %c0_i32, %c0_i32_0 : i32, i32, i32
  }
  func.func @transform_1(%arg0: i32) -> (i32, i32) {
    %c0_i32 = arith.constant 0 : i32
    %c0_i32_0 = arith.constant 0 : i32
    %c0_i32_1 = arith.constant 0 : i32
    return %c0_i32, %c0_i32_0 : i32, i32
  }
  func.func @transform_2(%arg0: i32) -> (i32, i32) {
    %c0_i32 = arith.constant 0 : i32
    %c0_i32_0 = arith.constant 0 : i32
    %c0_i32_1 = arith.constant 0 : i32
    return %c0_i32, %c0_i32_0 : i32, i32
  }
  func.func @transform_3(%arg0: i32) -> (i32, i32) {
    %c0_i32 = arith.constant 0 : i32
    %c0_i32_0 = arith.constant 0 : i32
    %c0_i32_1 = arith.constant 0 : i32
    return %c0_i32, %c0_i32_0 : i32, i32
  }
  func.func @transform_4(%arg0: i32) -> (i32, i32) {
    %c0_i32 = arith.constant 0 : i32
    %c0_i32_0 = arith.constant 0 : i32
    %c0_i32_1 = arith.constant 0 : i32
    return %c0_i32, %c0_i32_0 : i32, i32
  }
  func.func @transform_5(%arg0: i32) -> (i32, i32) {
    %c0_i32 = arith.constant 0 : i32
    %c0_i32_0 = arith.constant 0 : i32
    %c0_i32_1 = arith.constant 0 : i32
    return %c0_i32, %c0_i32_0 : i32, i32
  }
  func.func @transform_6(%arg0: i32) -> (i32, i32) {
    %c0_i32 = arith.constant 0 : i32
    %c0_i32_0 = arith.constant 0 : i32
    %c0_i32_1 = arith.constant 0 : i32
    return %c0_i32, %c0_i32_0 : i32, i32
  }
  func.func @transform_7(%arg0: i32) -> (i32, i32, i32) {
    %c0_i32 = arith.constant 0 : i32
    %c0_i32_0 = arith.constant 0 : i32
    %c0_i32_1 = arith.constant 0 : i32
    return %arg0, %c0_i32, %c0_i32_0 : i32, i32, i32
  }
}

</mosaic_0001>

<bundles_post_ra>
// kernel: tpu_custom_call.1
= control target key start
LH: loop header
LB: loop body
LE: loop exit
PB: predicated region body
PF: predicated region fallthrough
CT: control target
= control target key end

     0   :  { %12 = vsyncpa [#allocation3], 0  ;;  %s2667_s0 = inlined_call_operand.vmem [shape: f32[2,128,128], index: 0, kind: input, shape index: {}]   ;;  %s2668_s1 = inlined_call_operand.vmem [shape: f32[128,128], index: 1, kind: input, shape index: {}]   ;;  %s2669_s2 = inlined_call_operand.vmem [shape: f32[128,1], index: 2, kind: input, shape index: {}]   ;;  %s2670_s3 = inlined_call_operand.hbm [shape: f32[128,128], index: 3, kind: input, shape index: {}]   ;;  %s2671_s4 = inlined_call_operand.vmem [shape: f32[128,1], index: 4, kind: input, shape index: {}]   ;;  %s2672_s5 = inlined_call_operand.hbm [shape: f32[8,128], index: 5, kind: input, shape index: {}]   ;;  %s2673_s6 = inlined_call_operand.vmem [shape: f32[128,8], index: 6, kind: input, shape index: {}]   ;;  %s2674_s7 = inlined_call_operand.hbm [shape: f32[2,128,128], index: 7, kind: output, shape index: {}]  }
   0x1   :  { %13 = vsyncpa [#allocation6], 0 }
   0x2   :  { %14 = vsyncpa [#allocation4], 0 }
   0x3   :  { %16 = vsyncpa [#allocation4 + $0x1], 0  ;;  %s2163_s24 = smov 0   ;;  %s2165_s25 = smov 0  }
   0x4   :  { %s2167_s26 = smov 0   ;;  %s2169_s27 = smov 0  }
   0x5 LB: > { %s2184_s28 = sadd.s32 4294967295, %s2111_s27   ;;  %s1519_s29 = sadd.s32 4294967294, %s2111_s27   ;;  %s2111_s27 = sphi %s2169_s27, %s2688_s27   ;;  %s2107_s26 = sphi %s2167_s26, %s2687_s26   ;;  %s2103_s25 = sphi %s2165_s25, %s2686_s25   ;;  %s2099_s24 = sphi %s2163_s24, %s2685_s24  }
   0x6   : > { %s2188_s30 = sadd.s32 1, %s2111_s27   ;;  %s181_s8 = sadd.s32 1, %s2107_s26 }
   0x7   : > { %s178_s9 = ssub.s32 %s2111_s27, %s2188_s30  ;;  %p191_p0 = scmp.ne.s32.totalorder %s2107_s26, %s2103_s25 }
   0x8   : > { %p179_p1 = scmp.eq.s32.totalorder %s178_s9, 0  ;;  %p192_p2 = scmp.eq.s32.totalorder %s2184_s28, 1 }
   0x9   : > { %p197_p3 = scmp.ne.s32.totalorder %s2103_s25, %s2099_s24  ;;  %p198_p4 = scmp.eq.s32.totalorder %s1519_s29, 1 }
   0xa   : > { %s2199_s10 = scalar_select %p179_p1, %s2107_s26, %s181_s8  }
   0xb   : > { %p2201_p5 = por %p192_p2, %p191_p0  ;;  %p2205_p6 = por %p198_p4, %p197_p3 }
   0xc   : > { %p1520_p7 = scmp.ge.s32.totalorder %s2111_s27, 1  ;;  %p205_p8 = scmp.lt.s32.totalorder %s2111_s27, 3 }
   0xd   : > { %s2677_s12 = scalar_select %p2205_p6, 1, 0 }
   0xe   : > { %p2675_p9 = scmp.eq.s32.totalorder %s2184_s28, 0  ;;  %p2212_p10 = pnand %p1520_p7, %p205_p8 }
   0xf   : > { %s2113_s14 = smov [#allocation2]   ;;  %s2114_s17 = smov [#allocation5]  }
  0x10   : > { %s223_s15 = sshll.u32 %s2113_s14, 4  ;;  %p1852_p11 = pneg %p2212_p10  ;;  %s224_s15 = int_to_ptr.vmem [resolvable:$true] %s223_s15 }
  0x11   : > { %s240_s18 = sshll.u32 %s2114_s17, 4  ;;  %s2002_s19 = scalar_lea.vmem %s224_s15, 2048  ;;  %s241_s18 = int_to_ptr.vmem [resolvable:$true] %s240_s18 }
  0x12   : > { %p2220_p12 = pnand %p2675_p9, %p1852_p11  ;;  %p2003_p0 = scmp.ne.s32.totalorder %s224_s15, %s2002_s19 }
  0x13   : > { %p2010_p3 = scmp.lt.s32.totalorder %s224_s15, %s224_s15  ;;  %p2011_p4 = scmp.lt.s32.totalorder %s2002_s19, %s2002_s19 }
  0x14   : > { %p1993_p13 = pneg %p2220_p12 }
  0x15   : > { %p2012_p7 = por %p2011_p4, %p2010_p3 }
  0x16   : > { %p2005_p1 = pnand %p2003_p0, %p1993_p13 }
  0x18   : > { %p2006_p2 = pneg %p2005_p1 }
  0x1a   : > { %p2013_p8 = pnand %p2012_p7, %p2006_p2 }
  0x1c   : > { %2016 = shalt.err (!%p2013_p8)
}
  0x1d   : > { %s2115_s20 = smov 128   ;;  %s2116_s21 = smov 8  }
  0x1e   : > { %1855 = dma.hbm_to_vmem [thread:$0]  (!%p2220_p12), %s2670_s3, 2048, %s224_s15, [#allocation3], %s2115_s20, %s2115_s20, %s2116_s21  }
  0x1f   : > { %s2028_s29 = scalar_lea.vmem %s241_s18, 128  ;;  %p2036_p9 = scmp.lt.s32.totalorder %s241_s18, %s241_s18 }
  0x20   : > { %p2029_p11 = scmp.ne.s32.totalorder %s241_s18, %s2028_s29  ;;  %p2037_p6 = scmp.lt.s32.totalorder %s2028_s29, %s2028_s29 }
  0x22   : > { %p2031_p0 = pnand %p2029_p11, %p1993_p13  ;;  %p2038_p3 = por %p2037_p6, %p2036_p9 }
  0x24   : > { %p2032_p1 = pneg %p2031_p0 }
  0x26   : > { %p2039_p2 = pnand %p2038_p3, %p2032_p1 }
  0x28   : > { %2042 = shalt.err (!%p2039_p2)
}
  0x29   : > { %1858 = dma.hbm_to_vmem [thread:$0]  (!%p2220_p12), %s2672_s5, 128, %s241_s18, [#allocation6]  }
  0x2a   : > { %264 = sbr.rel (%p2212_p10) target bundleno = 1342 (0x53e), region = 48  ;;  %p2680_p4 = scmp.eq.s32.totalorder (!%p2212_p10), %s2184_s28, 0 }
  0x2f   : > { %2086 = dma.done.wait (%p2680_p4), [#allocation3], 2048   ;;  %p2681_p13 = pmov %p2680_p4 }
  0x30   : > { %p2682_p7 = pmov %p2680_p4 }
  0x31   : > { %2088 = vsyncadd (%p2681_p13), [#allocation3], 4294965248 }
  0x32   : > { %2090 = dma.done.wait (%p2682_p7), [#allocation6], 128   ;;  %p2683_p6 = pmov %p2680_p4 }
  0x33   : > { %p300_p9 = scmp.lt.s32.totalorder %s2184_s28, 1  ;;  %v2117_v0 = vmov 0   ;;  %v305_v5 = vld [vmem:[%s2668_s1] sm:$0xff]  ;;  %v336_v9 = vld [vmem:[%s2669_s2 + $0x78] sm:$0xff]  ;;  %v334_v10 = vld [vmem:[%s2669_s2 + $0x68] sm:$0xff]  ;;  %vm2119_vm0 = vmmov 0  }
  0x34   : > { %2092 = vsyncadd (%p2683_p6), [#allocation6], 4294967168  ;;  %1909 = vset.pattern.permute.xlu0 %v2117_v0  ;;  %1910 = vset.pattern.permute.xlu1 %v2117_v0  ;;  %v335_v12 = vld [vmem:[%s2669_s2 + $0x70] sm:$0xff]  ;;  %v333_v13 = vld [vmem:[%s2669_s2 + $0x60] sm:$0xff]  ;;  %vm987_vm1 = vcmask 64512   ;;  %s297_s15 = sand.u32 1, %s2103_s25  }
  0x35   : > { %s301_s13 = scalar_select %p300_p9, %s2184_s28, 1  ;;  %1699 = vmatprep.mubr.f32.mxu0 %v305_v5  ;;  %462 = vperm.xlu0 %1909, %v336_v9   ;;  %v332_v16 = vld [vmem:[%s2669_s2 + $0x58] sm:$0xff]  ;;  %v331_v17 = vld [vmem:[%s2669_s2 + $0x50] sm:$0xff]  ;;  %v330_v20 = vld [vmem:[%s2669_s2 + $0x48] sm:$0xff] }
  0x36   : > { %452 = vperm.xlu1 %1910, %v334_v10   ;;  %v329_v21 = vld [vmem:[%s2669_s2 + $0x40] sm:$0xff]  ;;  %v328_v24 = vld [vmem:[%s2669_s2 + $0x38] sm:$0xff]  ;;  %v327_v25 = vld [vmem:[%s2669_s2 + $0x30] sm:$0xff]  ;;  %s1527_s16 = sshll.u32 %s297_s15, 7  ;;  %s1568_s19 = sshll.u32 %s2184_s28, 11 }
  0x37   : > { %s1567_s14 = sshll.u32 %s301_s13, 7  ;;  %v326_v28 = vld [vmem:[%s2669_s2 + $0x28] sm:$0xff]  ;;  %v325_v29 = vld [vmem:[%s2669_s2 + $0x20] sm:$0xff]  ;;  %v307_v31 = vld [vmem:[%s2668_s1 + $0x10] sm:$0xff]  ;;  %s2572_s18 = scalar_lea.vmem [#allocation7], %s1527_s16 }
  0x38   : > { %s2257_s17 = scalar_lea.vmem %s2667_s0, %s1567_s14  ;;  %v306_v30 = vld [vmem:[%s2668_s1 + $0x8] sm:$0xff]  ;;  %v324_v32 = vld [vmem:[%s2669_s2 + $0x18] sm:$0xff]  ;;  %v323_v33 = vld [vmem:[%s2669_s2 + $0x10] sm:$0xff]  ;;  %s1435_s20 = sshll.u32 %s2572_s18, 4  ;;  %s2621_s20 = int_to_ptr.vmem [resolvable:$true] %s1435_s20 }
  0x39   : > { %v384_v1 = vld [vmem:[%s2257_s17 + $0x78] sm:$0xff]  ;;  %v383_v2 = vld [vmem:[%s2257_s17 + $0x70] sm:$0xff]  ;;  %v382_v3 = vld [vmem:[%s2257_s17 + $0x68] sm:$0xff]  ;;  %457 = vperm.xlu0 %1909, %v335_v12   ;;  %s2619_s23 = scalar_lea.hbm %s2674_s7, %s1568_s19  ;;  %s2627_s28 = scalar_lea.sflag [#allocation4], %s297_s15 }
  0x3a   : > { %1667 = vmatprep.subr.mxu0 %v384_v1  ;;  %v381_v4 = vld [vmem:[%s2257_s17 + $0x60] sm:$0xff]  ;;  %v380_v6 = vld [vmem:[%s2257_s17 + $0x58] sm:$0xff]  ;;  %v379_v7 = vld [vmem:[%s2257_s17 + $0x50] sm:$0xff]  ;;  %447 = vperm.xlu1 %1910, %v333_v13   ;;  %s2043_s29 = scalar_lea.vmem %s2621_s20, 2048 }
  0x3b   : > { %1668 = vmatpush3.msra.mxu0 %v384_v1  ;;  %v378_v8 = vld [vmem:[%s2257_s17 + $0x48] sm:$0xff]  ;;  %v377_v11 = vld [vmem:[%s2257_s17 + $0x40] sm:$0xff]  ;;  %v376_v14 = vld [vmem:[%s2257_s17 + $0x38] sm:$0xff]  ;;  %p2044_p10 = scmp.ne.s32.totalorder %s2621_s20, %s2043_s29 }
  0x3c   : > { %1669 = vmatprep.subr.mxu0 %v383_v2  ;;  %v375_v15 = vld [vmem:[%s2257_s17 + $0x30] sm:$0xff]  ;;  %v374_v18 = vld [vmem:[%s2257_s17 + $0x28] sm:$0xff]  ;;  %v373_v19 = vld [vmem:[%s2257_s17 + $0x20] sm:$0xff] }
  0x3d   : > { %1670 = vmatpush3.msra.mxu0 %v383_v2  ;;  %442 = vperm.xlu0 %1909, %v332_v16   ;;  %v372_v22 = vld [vmem:[%s2257_s17 + $0x18] sm:$0xff]  ;;  %v371_v23 = vld [vmem:[%s2257_s17 + $0x10] sm:$0xff]  ;;  %v370_v26 = vld [vmem:[%s2257_s17 + $0x8] sm:$0xff]  ;;  %p2045_p12 = pnand %p2044_p10, %p2201_p5 }
  0x3e   : > { %1671 = vmatprep.subr.mxu0 %v382_v3  ;;  %437 = vperm.xlu1 %1910, %v331_v17   ;;  %v369_v27 = vld [vmem:[%s2257_s17] sm:$0xff]  ;;  %v308_v34 = vld [vmem:[%s2668_s1 + $0x18] sm:$0xff]  ;;  %v322_v36 = vld [vmem:[%s2669_s2 + $0x8] sm:$0xff] }
  0x3f   : > { %1672 = vmatpush3.msra.mxu0 %v382_v3  ;;  %v309_v35 = vld [vmem:[%s2668_s1 + $0x20] sm:$0xff]  ;;  %v310_v38 = vld [vmem:[%s2668_s1 + $0x28] sm:$0xff]  ;;  %v311_v39 = vld [vmem:[%s2668_s1 + $0x30] sm:$0xff]  ;;  %p2046_p8 = pneg %p2045_p12 }
  0x40   : > { %1673 = vmatprep.subr.mxu0 %v381_v4  ;;  %v321_v37 = vld [vmem:[%s2669_s2] sm:$0xff]  ;;  %v368_v40 = vld [vmem:[%s2671_s4 + $0x78] sm:$0xff]  ;;  %v367_v41 = vld [vmem:[%s2671_s4 + $0x70] sm:$0xff] }
  0x41   : > { %1674 = vmatpush3.msra.mxu0 %v381_v4  ;;  %432 = vperm.xlu0 %1909, %v330_v20   ;;  %v312_v42 = vld [vmem:[%s2668_s1 + $0x38] sm:$0xff]  ;;  %v313_v43 = vld [vmem:[%s2668_s1 + $0x40] sm:$0xff]  ;;  %v366_v44 = vld [vmem:[%s2671_s4 + $0x68] sm:$0xff] }
  0x42   : > { %1675 = vmatprep.subr.mxu0 %v380_v6  ;;  %427 = vperm.xlu1 %1910, %v329_v21   ;;  %v365_v45 = vld [vmem:[%s2671_s4 + $0x60] sm:$0xff]  ;;  %v314_v46 = vld [vmem:[%s2668_s1 + $0x48] sm:$0xff]  ;;  %v315_v47 = vld [vmem:[%s2668_s1 + $0x50] sm:$0xff] }
  0x43   : > { %1676 = vmatpush3.msra.mxu0 %v380_v6  ;;  %v364_v48 = vld [vmem:[%s2671_s4 + $0x58] sm:$0xff]  ;;  %v363_v49 = vld [vmem:[%s2671_s4 + $0x50] sm:$0xff]  ;;  %v317_v51 = vld [vmem:[%s2668_s1 + $0x60] sm:$0xff] }
  0x44   : > { %1677 = vmatprep.subr.mxu0 %v379_v7  ;;  %v316_v50 = vld [vmem:[%s2668_s1 + $0x58] sm:$0xff]  ;;  %v362_v52 = vld [vmem:[%s2671_s4 + $0x48] sm:$0xff]  ;;  %v361_v53 = vld [vmem:[%s2671_s4 + $0x40] sm:$0xff] }
  0x45   : > { %1678 = vmatpush3.msra.mxu0 %v379_v7  ;;  %422 = vperm.xlu0 %1909, %v328_v24   ;;  %v318_v54 = vld [vmem:[%s2668_s1 + $0x68] sm:$0xff]  ;;  %v319_v55 = vld [vmem:[%s2668_s1 + $0x70] sm:$0xff]  ;;  %v360_v56 = vld [vmem:[%s2671_s4 + $0x38] sm:$0xff] }
  0x46   : > { %1679 = vmatprep.subr.mxu0 %v378_v8  ;;  %417 = vperm.xlu1 %1910, %v327_v25   ;;  %v359_v57 = vld [vmem:[%s2671_s4 + $0x30] sm:$0xff]  ;;  %v320_v58 = vld [vmem:[%s2668_s1 + $0x78] sm:$0xff]  ;;  %v358_v59 = vld [vmem:[%s2671_s4 + $0x28] sm:$0xff] }
  0x47   : > { %1680 = vmatpush3.msra.mxu0 %v378_v8  ;;  %v357_v60 = vld [vmem:[%s2671_s4 + $0x20] sm:$0xff]  ;;  %v356_v61 = vld [vmem:[%s2671_s4 + $0x18] sm:$0xff]  ;;  %v355_v62 = vld [vmem:[%s2671_s4 + $0x10] sm:$0xff] }
  0x48   : > { %1681 = vmatprep.subr.mxu0 %v377_v11  ;;  %v354_v63 = vld [vmem:[%s2671_s4 + $0x8] sm:$0xff]  ;;  %v353_v0 = vld [vmem:[%s2671_s4] sm:$0xff] }
  0x49   : > { %1682 = vmatpush3.msra.mxu0 %v377_v11  ;;  %412 = vperm.xlu0 %1909, %v326_v28   ;;  %v337_v1 = vld [vmem:[#allocation2] sm:$0xff] }
  0x4a   : > { %1683 = vmatprep.subr.mxu0 %v376_v14  ;;  %407 = vperm.xlu1 %1910, %v325_v29  }
  0x4b   : > { %1684 = vmatpush3.msra.mxu0 %v376_v14  ;;  %1755 = vmatprep.mubr.f32.mxu1 %v337_v1 }
  0x4c   : > { %1685 = vmatprep.subr.mxu0 %v375_v15 }
  0x4d   : > { %1686 = vmatpush3.msra.mxu0 %v375_v15  ;;  %402 = vperm.xlu0 %1909, %v324_v32  }
  0x4e   : > { %1687 = vmatprep.subr.mxu0 %v374_v18  ;;  %397 = vperm.xlu1 %1910, %v323_v33  }
  0x4f   : > { %1688 = vmatpush3.msra.mxu0 %v374_v18 }
  0x50   : > { %1689 = vmatprep.subr.mxu0 %v373_v19 }
  0x51   : > { %1690 = vmatpush3.msra.mxu0 %v373_v19  ;;  %392 = vperm.xlu0 %1909, %v322_v36  }
  0x52   : > { %1691 = vmatprep.subr.mxu0 %v372_v22  ;;  %387 = vperm.xlu1 %1910, %v321_v37  }
  0x53   : > { %1692 = vmatpush3.msra.mxu0 %v372_v22 }
  0x54   : > { %1693 = vmatprep.subr.mxu0 %v371_v23 }
  0x55   : > { %1694 = vmatpush3.msra.mxu0 %v371_v23  ;;  %703 = vperm.xlu0 %1909, %v368_v40  }
  0x56   : > { %1695 = vmatprep.subr.mxu0 %v370_v26  ;;  %698 = vperm.xlu1 %1910, %v367_v41  }
  0x57   : > { %1696 = vmatpush3.msra.mxu0 %v370_v26 }
  0x58   : > { %1697 = vmatprep.subr.mxu0 %v369_v27 }
  0x59   : > { %1698 = vmatpush3.msra.mxu0 %v369_v27  ;;  %693 = vperm.xlu0 %1909, %v366_v44  }
  0x5a   : > { %1700 = vmatmul.mubr.f32.vlgmr.msra.gmra.mxu0 %v306_v30  ;;  %688 = vperm.xlu1 %1910, %v365_v45  }
  0x5b   : > { %1702 = vmatprep.mubr.f32.mxu0 %v307_v31 }
  0x5d   : > { %683 = vperm.xlu0 %1909, %v364_v48  }
  0x5e   : > { %1703 = vmatmul.mubr.f32.gmra.mxu0 %v308_v34  ;;  %678 = vperm.xlu1 %1910, %v363_v49  }
  0x5f   : > { %1705 = vmatprep.mubr.f32.mxu0 %v309_v35 }
  0x61   : > { %673 = vperm.xlu0 %1909, %v362_v52  }
  0x62   : > { %1706 = vmatmul.mubr.f32.gmra.mxu0 %v310_v38  ;;  %668 = vperm.xlu1 %1910, %v361_v53  }
  0x63   : > { %1708 = vmatprep.mubr.f32.mxu0 %v311_v39 }
  0x65   : > { %663 = vperm.xlu0 %1909, %v360_v56  }
  0x66   : > { %1709 = vmatmul.mubr.f32.gmra.mxu0 %v312_v42  ;;  %658 = vperm.xlu1 %1910, %v359_v57  }
  0x67   : > { %1711 = vmatprep.mubr.f32.mxu0 %v313_v43 }
  0x69   : > { %653 = vperm.xlu0 %1909, %v358_v59  }
  0x6a   : > { %1712 = vmatmul.mubr.f32.gmra.mxu0 %v314_v46  ;;  %648 = vperm.xlu1 %1910, %v357_v60  }
  0x6b   : > { %1714 = vmatprep.mubr.f32.mxu0 %v315_v47 }
  0x6d   : > { %643 = vperm.xlu0 %1909, %v356_v61  }
  0x6e   : > { %1715 = vmatmul.mubr.f32.gmra.mxu0 %v316_v50  ;;  %638 = vperm.xlu1 %1910, %v355_v62  }
  0x6f   : > { %1717 = vmatprep.mubr.f32.mxu0 %v317_v51 }
  0x71   : > { %633 = vperm.xlu0 %1909, %v354_v63  }
  0x72   : > { %1718 = vmatmul.mubr.f32.gmra.mxu0 %v318_v54  ;;  %628 = vperm.xlu1 %1910, %v353_v0  }
  0x73   : > { %1720 = vmatprep.mubr.f32.mxu0 %v319_v55 }
  0x76   : > { %1721 = vmatmul.mubr.f32.gmra.mxu0 %v320_v58 }
  0xb0   : > { %v463_v8 = vpop.permute.xlu0 %462 }
  0xb1   : > { %v453_v10 = vpop.permute.xlu1 %452 }
  0xb4   : > { %v458_v13 = vpop.permute.xlu0 %457 }
  0xb5   : > { %v448_v15 = vpop.permute.xlu1 %447 }
  0xb8   : > { %v443_v18 = vpop.permute.xlu0 %442 }
  0xb9   : > { %v438_v20 = vpop.permute.xlu1 %437 }
  0xbc   : > { %v433_v24 = vpop.permute.xlu0 %432 }
  0xbd   : > { %v428_v29 = vpop.permute.xlu1 %427 }
  0xc0   : > { %v423_v34 = vpop.permute.xlu0 %422 }
  0xc1   : > { %v418_v37 = vpop.permute.xlu1 %417 }
  0xc4   : > { %v413_v42 = vpop.permute.xlu0 %412 }
  0xc5   : > { %v408_v45 = vpop.permute.xlu1 %407 }
  0xc8   : > { %v403_v50 = vpop.permute.xlu0 %402 }
  0xc9   : > { %v398_v53 = vpop.permute.xlu1 %397 }
  0xcc   : > { %v393_v58 = vpop.permute.xlu0 %392 }
  0xcd   : > { %v388_v61 = vpop.permute.xlu1 %387 }
 0x11a   : > { %v2419_v2 = vpop.f32.mrf.mxu0 }
 0x11b   : > { %v537_v59 = vadd.f32 %v2419_v2, %v393_v58  ;;  %v340_v2 = vld [vmem:[#allocation2 + $0x18] sm:$0xff] }
 0x11c   : > { %v2421_v3 = vpop.f32.mrf.mxu0 }
 0x11d   : > { %v532_v62 = vadd.f32 %v2421_v3, %v388_v61  ;;  %v611_v0 = vmax.f32 %v537_v59, 0.0  ;;  %v342_v3 = vld [vmem:[#allocation2 + $0x28] sm:$0xff] }
 0x11e   : > { %v2423_v4 = vpop.f32.mrf.mxu0 }
 0x11f   : > { %v547_v54 = vadd.f32 %v2423_v4, %v403_v50  ;;  %v610_v1 = vmax.f32 %v532_v62, 0.0  ;;  %v338_v4 = vld [vmem:[#allocation2 + $0x8] sm:$0xff] }
 0x120   : > { %v2425_v5 = vpop.f32.mrf.mxu0 }
 0x121   : > { %v542_v56 = vadd.f32 %v2425_v5, %v398_v53  ;;  %v613_v60 = vmax.f32 %v547_v54, 0.0  ;;  %v339_v5 = vld [vmem:[#allocation2 + $0x10] sm:$0xff] }
 0x122   : > { %v1707_v6 = vpop.f32.mrf.mxu0 }
 0x123   : > { %v557_v48 = vadd.f32 %v1707_v6, %v413_v42  ;;  %v612_v63 = vmax.f32 %v542_v56, 0.0  ;;  %v341_v6 = vld [vmem:[#allocation2 + $0x20] sm:$0xff] }
 0x124   : > { %v551_v7 = vpop.f32.mrf.mxu0 }
 0x125   : > { %v552_v51 = vadd.f32 %v551_v7, %v408_v45  ;;  %v615_v55 = vmax.f32 %v557_v48, 0.0  ;;  %v343_v7 = vld [vmem:[#allocation2 + $0x30] sm:$0xff] }
 0x126   : > { %v1710_v9 = vpop.f32.mrf.mxu0 }
 0x127   : > { %v567_v43 = vadd.f32 %v1710_v9, %v423_v34  ;;  %v614_v57 = vmax.f32 %v552_v51, 0.0  ;;  %v345_v9 = vld [vmem:[#allocation2 + $0x40] sm:$0xff]  ;;  %v2118_v51 = vmov 0.0  }
 0x128   : > { %v561_v11 = vpop.f32.mrf.mxu0  ;;  %1779 = vmatprep.subr.mxu0 %v2118_v51  ;;  %1811 = vmatprep.mubr.msk.f32.mxu0 %vm2119_vm0, %v2118_v51 }
 0x129   : > { %v562_v46 = vadd.f32 %v561_v11, %v418_v37  ;;  %v617_v49 = vmax.f32 %v567_v43, 0.0  ;;  %v347_v11 = vld [vmem:[#allocation2 + $0x50] sm:$0xff] }
 0x12a   : > { %v1713_v12 = vpop.f32.mrf.mxu0 }
 0x12b   : > { %v577_v38 = vadd.f32 %v1713_v12, %v433_v24  ;;  %v616_v52 = vmax.f32 %v562_v46, 0.0  ;;  %v348_v12 = vld [vmem:[#allocation2 + $0x58] sm:$0xff] }
 0x12c   : > { %v571_v14 = vpop.f32.mrf.mxu0 }
 0x12d   : > { %v572_v40 = vadd.f32 %v571_v14, %v428_v29  ;;  %v619_v44 = vmax.f32 %v577_v38, 0.0  ;;  %v350_v14 = vld [vmem:[#allocation2 + $0x68] sm:$0xff] }
 0x12e   : > { %v1716_v16 = vpop.f32.mrf.mxu0 }
 0x12f   : > { %v587_v32 = vadd.f32 %v1716_v16, %v443_v18  ;;  %v618_v47 = vmax.f32 %v572_v40, 0.0  ;;  %v352_v16 = vld [vmem:[#allocation2 + $0x78] sm:$0xff] }
 0x130   : > { %v581_v17 = vpop.f32.mrf.mxu0 }
 0x131   : > { %v582_v35 = vadd.f32 %v581_v17, %v438_v20  ;;  %v621_v39 = vmax.f32 %v587_v32, 0.0 }
 0x132   : > { %v1719_v19 = vpop.f32.mrf.mxu0 }
 0x133   : > { %v597_v26 = vadd.f32 %v1719_v19, %v453_v10  ;;  %v620_v41 = vmax.f32 %v582_v35, 0.0  ;;  %v346_v10 = vld [vmem:[#allocation2 + $0x48] sm:$0xff] }
 0x134   : > { %v591_v21 = vpop.f32.mrf.mxu0 }
 0x135   : > { %v592_v30 = vadd.f32 %v591_v21, %v448_v15  ;;  %v623_v33 = vmax.f32 %v597_v26, 0.0  ;;  %v351_v15 = vld [vmem:[#allocation2 + $0x70] sm:$0xff] }
 0x136   : > { %v1722_v22 = vpop.f32.mrf.mxu0 }
 0x137   : > { %v607_v23 = vadd.f32 %v1722_v22, %v463_v8  ;;  %v622_v36 = vmax.f32 %v592_v30, 0.0  ;;  %v344_v8 = vld [vmem:[#allocation2 + $0x38] sm:$0xff] }
 0x138   : > { %v601_v25 = vpop.f32.mrf.mxu0 }
 0x139   : > { %v625_v27 = vmax.f32 %v607_v23, 0.0  ;;  %v602_v28 = vadd.f32 %v601_v25, %v458_v13  ;;  %v349_v13 = vld [vmem:[#allocation2 + $0x60] sm:$0xff]  ;;  %v704_v23 = vpop.permute.xlu0 %703 }
 0x13b   : > { %v624_v31 = vmax.f32 %v602_v28, 0.0  ;;  %1723 = vmatprep.subr.mxu1 %v625_v27 }
 0x13c   : > { %1724 = vmatpush3.msra.mxu1 %v625_v27  ;;  %v699_v27 = vpop.permute.xlu1 %698 }
 0x13d   : > { %1725 = vmatprep.subr.mxu1 %v624_v31  ;;  %v694_v28 = vpop.permute.xlu0 %693 }
 0x13e   : > { %1726 = vmatpush3.msra.mxu1 %v624_v31 }
 0x13f   : > { %1727 = vmatprep.subr.mxu1 %v623_v33 }
 0x140   : > { %1728 = vmatpush3.msra.mxu1 %v623_v33  ;;  %v689_v32 = vpop.permute.xlu1 %688 }
 0x141   : > { %1729 = vmatprep.subr.mxu1 %v622_v36  ;;  %v684_v33 = vpop.permute.xlu0 %683 }
 0x142   : > { %1730 = vmatpush3.msra.mxu1 %v622_v36 }
 0x143   : > { %1731 = vmatprep.subr.mxu1 %v621_v39 }
 0x144   : > { %1732 = vmatpush3.msra.mxu1 %v621_v39  ;;  %v679_v37 = vpop.permute.xlu1 %678 }
 0x145   : > { %1733 = vmatprep.subr.mxu1 %v620_v41  ;;  %v674_v39 = vpop.permute.xlu0 %673 }
 0x146   : > { %1734 = vmatpush3.msra.mxu1 %v620_v41 }
 0x147   : > { %1735 = vmatprep.subr.mxu1 %v619_v44 }
 0x148   : > { %1736 = vmatpush3.msra.mxu1 %v619_v44  ;;  %v669_v45 = vpop.permute.xlu1 %668 }
 0x149   : > { %1737 = vmatprep.subr.mxu1 %v618_v47  ;;  %v664_v44 = vpop.permute.xlu0 %663 }
 0x14a   : > { %1738 = vmatpush3.msra.mxu1 %v618_v47 }
 0x14b   : > { %1739 = vmatprep.subr.mxu1 %v617_v49 }
 0x14c   : > { %1740 = vmatpush3.msra.mxu1 %v617_v49  ;;  %v659_v50 = vpop.permute.xlu1 %658 }
 0x14d   : > { %1741 = vmatprep.subr.mxu1 %v616_v52  ;;  %v654_v49 = vpop.permute.xlu0 %653 }
 0x14e   : > { %1742 = vmatpush3.msra.mxu1 %v616_v52 }
 0x14f   : > { %1743 = vmatprep.subr.mxu1 %v615_v55 }
 0x150   : > { %1744 = vmatpush3.msra.mxu1 %v615_v55  ;;  %v649_v56 = vpop.permute.xlu1 %648 }
 0x151   : > { %1745 = vmatprep.subr.mxu1 %v614_v57  ;;  %v644_v55 = vpop.permute.xlu0 %643 }
 0x152   : > { %1746 = vmatpush3.msra.mxu1 %v614_v57 }
 0x153   : > { %1747 = vmatprep.subr.mxu1 %v613_v60 }
 0x154   : > { %1748 = vmatpush3.msra.mxu1 %v613_v60  ;;  %v639_v61 = vpop.permute.xlu1 %638 }
 0x155   : > { %1749 = vmatprep.subr.mxu1 %v612_v63  ;;  %v634_v60 = vpop.permute.xlu0 %633 }
 0x156   : > { %1750 = vmatpush3.msra.mxu1 %v612_v63 }
 0x157   : > { %1751 = vmatprep.subr.mxu1 %v611_v0 }
 0x158   : > { %1752 = vmatpush3.msra.mxu1 %v611_v0  ;;  %v629_v0 = vpop.permute.xlu1 %628 }
 0x159   : > { %1753 = vmatprep.subr.mxu1 %v610_v1 }
 0x15a   : > { %1754 = vmatpush3.msra.mxu1 %v610_v1 }
 0x15b   : > { %1756 = vmatmul.mubr.f32.vlgmr.msra.gmra.mxu1 %v338_v4 }
 0x15c   : > { %1758 = vmatprep.mubr.f32.mxu1 %v339_v5 }
 0x15f   : > { %1759 = vmatmul.mubr.f32.gmra.mxu1 %v340_v2 }
 0x160   : > { %1761 = vmatprep.mubr.f32.mxu1 %v341_v6 }
 0x163   : > { %1762 = vmatmul.mubr.f32.gmra.mxu1 %v342_v3 }
 0x164   : > { %1764 = vmatprep.mubr.f32.mxu1 %v343_v7 }
 0x167   : > { %1765 = vmatmul.mubr.f32.gmra.mxu1 %v344_v8 }
 0x168   : > { %1767 = vmatprep.mubr.f32.mxu1 %v345_v9 }
 0x16b   : > { %1768 = vmatmul.mubr.f32.gmra.mxu1 %v346_v10 }
 0x16c   : > { %1770 = vmatprep.mubr.f32.mxu1 %v347_v11 }
 0x16f   : > { %1771 = vmatmul.mubr.f32.gmra.mxu1 %v348_v12 }
 0x170   : > { %1773 = vmatprep.mubr.f32.mxu1 %v349_v13 }
 0x173   : > { %1774 = vmatmul.mubr.f32.gmra.mxu1 %v350_v14 }
 0x174   : > { %1776 = vmatprep.mubr.f32.mxu1 %v351_v15 }
 0x177   : > { %1777 = vmatmul.mubr.f32.gmra.mxu1 %v352_v16 }
 0x21b   : > { %v1757_v17 = vpop.f32.mrf.mxu1 }
 0x21c   : > { %v2472_v62 = vadd.f32 %v1757_v17, %v634_v60  ;;  %v981_v60 = vld [vmem:[%s2673_s6 + $0x50] sm:$0xff] }
 0x21d   : > { %v2431_v18 = vpop.f32.mrf.mxu1 }
 0x21e   : > { %v2480_v1 = vadd.f32 %v2431_v18, %v629_v0  ;;  %v982_v0 = vld [vmem:[%s2673_s6 + $0x58] sm:$0xff] }
 0x21f   : > { %v1760_v19 = vpop.f32.mrf.mxu1 }
 0x220   : > { %v2466_v58 = vadd.f32 %v1760_v19, %v644_v55  ;;  %v980_v55 = vld [vmem:[%s2673_s6 + $0x48] sm:$0xff] }
 0x221   : > { %v782_v20 = vpop.f32.mrf.mxu1 }
 0x222   : > { %v2475_v63 = vadd.f32 %v782_v20, %v639_v61  ;;  %v976_v61 = vld [vmem:[%s2673_s6 + $0x28] sm:$0xff] }
 0x223   : > { %v1763_v21 = vpop.f32.mrf.mxu1 }
 0x224   : > { %v2460_v54 = vadd.f32 %v1763_v21, %v654_v49  ;;  %v973_v49 = vld [vmem:[%s2673_s6 + $0x10] sm:$0xff] }
 0x225   : > { %v792_v22 = vpop.f32.mrf.mxu1 }
 0x226   : > { %v2469_v59 = vadd.f32 %v792_v22, %v649_v56  ;;  %v975_v56 = vld [vmem:[%s2673_s6 + $0x20] sm:$0xff] }
 0x227   : > { %v1766_v24 = vpop.f32.mrf.mxu1 }
 0x228   : > { %v2454_v52 = vadd.f32 %v1766_v24, %v664_v44  ;;  %v972_v44 = vld [vmem:[%s2673_s6 + $0x8] sm:$0xff] }
 0x229   : > { %v802_v25 = vpop.f32.mrf.mxu1 }
 0x22a   : > { %v2463_v57 = vadd.f32 %v802_v25, %v659_v50  ;;  %v979_v50 = vld [vmem:[%s2673_s6 + $0x40] sm:$0xff] }
 0x22b   : > { %v1769_v26 = vpop.f32.mrf.mxu1 }
 0x22c   : > { %v2447_v47 = vadd.f32 %v1769_v26, %v674_v39 }
 0x22d   : > { %v812_v29 = vpop.f32.mrf.mxu1 }
 0x22e   : > { %v2457_v53 = vadd.f32 %v812_v29, %v669_v45  ;;  %v978_v45 = vld [vmem:[%s2673_s6 + $0x38] sm:$0xff] }
 0x22f   : > { %v1772_v30 = vpop.f32.mrf.mxu1 }
 0x230   : > { %v2441_v43 = vadd.f32 %v1772_v30, %v684_v33 }
 0x231   : > { %v822_v31 = vpop.f32.mrf.mxu1 }
 0x232   : > { %v2450_v48 = vadd.f32 %v822_v31, %v679_v37 }
 0x233   : > { %v1775_v34 = vpop.f32.mrf.mxu1 }
 0x234   : > { %v2438_v42 = vadd.f32 %v1775_v34, %v694_v28  ;;  %v899_v34 = vld [vmem:[#allocation5] sm:$0xff] }
 0x235   : > { %v832_v35 = vpop.f32.mrf.mxu1 }
 0x236   : > { %v2444_v46 = vadd.f32 %v832_v35, %v689_v32  ;;  %v971_v35 = vld [vmem:[%s2673_s6] sm:$0xff] }
 0x237   : > { %v1778_v36 = vpop.f32.mrf.mxu1 }
 0x238   : > { %v2433_v38 = vadd.f32 %v1778_v36, %v704_v23  ;;  %v977_v36 = vld [vmem:[%s2673_s6 + $0x30] sm:$0xff] }
 0x239   : > { %v842_v40 = vpop.f32.mrf.mxu1  ;;  %1825 = vmatprep.mubr.msk.f32.mxu1 %vm987_vm1, %v977_v36 }
 0x23a   : > { %v2435_v41 = vadd.f32 %v842_v40, %v699_v27  ;;  %881 = vadd.xlane.f32.xlu0 %v2433_v38 }
 0x23c   : > { %879 = vadd.xlane.f32.xlu1 %v2435_v41 }
 0x23e   : > { %877 = vadd.xlane.f32.xlu0 %v2438_v42 }
 0x240   : > { %873 = vadd.xlane.f32.xlu1 %v2441_v43 }
 0x242   : > { %875 = vadd.xlane.f32.xlu0 %v2444_v46 }
 0x244   : > { %869 = vadd.xlane.f32.xlu1 %v2447_v47 }
 0x246   : > { %871 = vadd.xlane.f32.xlu0 %v2450_v48 }
 0x248   : > { %865 = vadd.xlane.f32.xlu1 %v2454_v52 }
 0x24a   : > { %867 = vadd.xlane.f32.xlu0 %v2457_v53 }
 0x24c   : > { %861 = vadd.xlane.f32.xlu1 %v2460_v54 }
 0x24e   : > { %863 = vadd.xlane.f32.xlu0 %v2463_v57 }
 0x250   : > { %857 = vadd.xlane.f32.xlu1 %v2466_v58 }
 0x252   : > { %859 = vadd.xlane.f32.xlu0 %v2469_v59 }
 0x254   : > { %853 = vadd.xlane.f32.xlu1 %v2472_v62 }
 0x256   : > { %855 = vadd.xlane.f32.xlu0 %v2475_v63 }
 0x25a   : > { %851 = vadd.xlane.f32.xlu0 %v2480_v1 }
 0x2c3   : > { %v882_v4 = vpop.xlane.xlu0 %881 }
 0x2c4   : > { %v898_v5 = vmul.f32 0.0078125, %v882_v4  ;;  %v983_v4 = vld [vmem:[%s2673_s6 + $0x60] sm:$0xff] }
 0x2c5   : > { %v880_v2 = vpop.xlane.xlu1 %879 }
 0x2c6   : > { %v897_v6 = vmul.f32 0.0078125, %v880_v2  ;;  %1780 = vmatpush3.msra.mxu0 %v898_v5  ;;  %v984_v5 = vld [vmem:[%s2673_s6 + $0x68] sm:$0xff]  ;;  %v985_v2 = vld [vmem:[%s2673_s6 + $0x70] sm:$0xff] }
 0x2c7   : > { %1781 = vmatprep.subr.mxu0 %v2118_v51  ;;  %v878_v3 = vpop.xlane.xlu0 %877 }
 0x2c8   : > { %v896_v7 = vmul.f32 0.0078125, %v878_v3  ;;  %1782 = vmatpush3.msra.mxu0 %v897_v6  ;;  %v986_v6 = vld [vmem:[%s2673_s6 + $0x78] sm:$0xff] }
 0x2c9   : > { %1783 = vmatprep.subr.mxu0 %v2118_v51  ;;  %v874_v8 = vpop.xlane.xlu1 %873 }
 0x2ca   : > { %1784 = vmatpush3.msra.mxu0 %v896_v7  ;;  %v894_v12 = vmul.f32 0.0078125, %v874_v8 }
 0x2cb   : > { %v876_v9 = vpop.xlane.xlu0 %875  ;;  %1785 = vmatprep.subr.mxu0 %v2118_v51 }
 0x2cc   : > { %v895_v10 = vmul.f32 0.0078125, %v876_v9 }
 0x2cd   : > { %v870_v11 = vpop.xlane.xlu1 %869 }
 0x2ce   : > { %1786 = vmatpush3.msra.mxu0 %v895_v10  ;;  %v892_v16 = vmul.f32 0.0078125, %v870_v11 }
 0x2cf   : > { %1787 = vmatprep.subr.mxu0 %v2118_v51  ;;  %v872_v13 = vpop.xlane.xlu0 %871 }
 0x2d0   : > { %v893_v14 = vmul.f32 0.0078125, %v872_v13  ;;  %1788 = vmatpush3.msra.mxu0 %v894_v12 }
 0x2d1   : > { %v866_v15 = vpop.xlane.xlu1 %865  ;;  %1789 = vmatprep.subr.mxu0 %v2118_v51 }
 0x2d2   : > { %1790 = vmatpush3.msra.mxu0 %v893_v14  ;;  %v890_v20 = vmul.f32 0.0078125, %v866_v15 }
 0x2d3   : > { %1791 = vmatprep.subr.mxu0 %v2118_v51  ;;  %v868_v17 = vpop.xlane.xlu0 %867 }
 0x2d4   : > { %v891_v18 = vmul.f32 0.0078125, %v868_v17  ;;  %1792 = vmatpush3.msra.mxu0 %v892_v16 }
 0x2d5   : > { %v862_v19 = vpop.xlane.xlu1 %861  ;;  %1793 = vmatprep.subr.mxu0 %v2118_v51 }
 0x2d6   : > { %1794 = vmatpush3.msra.mxu0 %v891_v18  ;;  %v888_v24 = vmul.f32 0.0078125, %v862_v19 }
 0x2d7   : > { %1795 = vmatprep.subr.mxu0 %v2118_v51  ;;  %v864_v21 = vpop.xlane.xlu0 %863 }
 0x2d8   : > { %v889_v22 = vmul.f32 0.0078125, %v864_v21  ;;  %1796 = vmatpush3.msra.mxu0 %v890_v20 }
 0x2d9   : > { %v858_v23 = vpop.xlane.xlu1 %857  ;;  %1797 = vmatprep.subr.mxu0 %v2118_v51 }
 0x2da   : > { %1798 = vmatpush3.msra.mxu0 %v889_v22  ;;  %v886_v27 = vmul.f32 0.0078125, %v858_v23 }
 0x2db   : > { %1799 = vmatprep.subr.mxu0 %v2118_v51  ;;  %v860_v25 = vpop.xlane.xlu0 %859 }
 0x2dc   : > { %v887_v26 = vmul.f32 0.0078125, %v860_v25  ;;  %1800 = vmatpush3.msra.mxu0 %v888_v24 }
 0x2dd   : > { %1801 = vmatprep.subr.mxu0 %v2118_v51  ;;  %v854_v28 = vpop.xlane.xlu1 %853 }
 0x2de   : > { %1802 = vmatpush3.msra.mxu0 %v887_v26  ;;  %v884_v31 = vmul.f32 0.0078125, %v854_v28 }
 0x2df   : > { %1803 = vmatprep.subr.mxu0 %v2118_v51  ;;  %v856_v29 = vpop.xlane.xlu0 %855 }
 0x2e0   : > { %v885_v30 = vmul.f32 0.0078125, %v856_v29  ;;  %1804 = vmatpush3.msra.mxu0 %v886_v27 }
 0x2e1   : > { %1805 = vmatprep.subr.mxu0 %v2118_v51 }
 0x2e2   : > { %1806 = vmatpush3.msra.mxu0 %v885_v30 }
 0x2e3   : > { %1807 = vmatprep.subr.mxu0 %v2118_v51  ;;  %v852_v32 = vpop.xlane.xlu0 %851 }
 0x2e4   : > { %v883_v33 = vmul.f32 0.0078125, %v852_v32  ;;  %1808 = vmatpush3.msra.mxu0 %v884_v31 }
 0x2e5   : > { %1809 = vmatprep.subr.mxu0 %v2118_v51  ;;  %v974_v51 = vld [vmem:[%s2673_s6 + $0x18] sm:$0xff] }
 0x2e6   : > { %1810 = vmatpush3.msra.mxu0 %v883_v33 }
 0x2e7   : > { %1812 = vmatmul.mubr.f32.vlgmr.msra.gmra.mxu0 %v899_v34 }
 0x2e8   : > { %1816 = vmatprep.mubr.msk.f32.mxu0 %vm987_vm1, %v971_v35 }
 0x3a7   : > { %v966_v37 = vpop.f32.mrf.mxu0 }
 0x3a8   : > { %v970_v39 = vmax.f32 %v966_v37, 0.0 }
 0x3a9   : > { %v1813_v40 = vpop.f32.mrf.mxu0 }
 0x3aa   : > { %1814 = vmatprep.subr.mxu0 %v970_v39  ;;  %1840 = vmatprep.subr.mxu1 %v970_v39 }
 0x3ab   : > { %1815 = vmatpush3.msra.mxu0 %v970_v39  ;;  %1841 = vmatpush3.msra.mxu1 %v970_v39 }
 0x3ac   : > { %1817 = vmatmul.mubr.msk.f32.vlgmr.msra.gmra.mxu0 %vm987_vm1, %v972_v44  ;;  %1826 = vmatmul.mubr.msk.f32.vlgmr.msra.gmra.mxu1 %vm987_vm1, %v978_v45 }
 0x3ad   : > { %1819 = vmatprep.mubr.msk.f32.mxu0 %vm987_vm1, %v973_v49  ;;  %1828 = vmatprep.mubr.msk.f32.mxu1 %vm987_vm1, %v979_v50 }
 0x3b0   : > { %1820 = vmatmul.mubr.msk.f32.gmra.mxu0 %vm987_vm1, %v974_v51  ;;  %1829 = vmatmul.mubr.msk.f32.gmra.mxu1 %vm987_vm1, %v980_v55 }
 0x3b1   : > { %1822 = vmatprep.mubr.msk.f32.mxu0 %vm987_vm1, %v975_v56  ;;  %1831 = vmatprep.mubr.msk.f32.mxu1 %vm987_vm1, %v981_v60 }
 0x3b4   : > { %1823 = vmatmul.mubr.msk.f32.gmra.mxu0 %vm987_vm1, %v976_v61  ;;  %1832 = vmatmul.mubr.msk.f32.gmra.mxu1 %vm987_vm1, %v982_v0 }
 0x3b5   : > { %1834 = vmatprep.mubr.msk.f32.mxu1 %vm987_vm1, %v983_v4 }
 0x3b8   : > { %1835 = vmatmul.mubr.msk.f32.gmra.mxu1 %vm987_vm1, %v984_v5 }
 0x3b9   : > { %1837 = vmatprep.mubr.msk.f32.mxu1 %vm987_vm1, %v985_v2 }
 0x3bc   : > { %1838 = vmatmul.mubr.msk.f32.gmra.mxu1 %vm987_vm1, %v986_v6 }
 0x46c   : > { %v1818_v3 = vpop.f32.mrf.mxu0  ;;  %v1827_v7 = vpop.f32.mrf.mxu1 }
 0x46d   : > { %v1547_v8 = vmul.f32 -1.442695, %v1818_v3  ;;  %v1553_v9 = vmul.f32 -1.442695, %v1827_v7 }
 0x46e   : > { %v1102_v10 = vpop.f32.mrf.mxu0  ;;  %v1132_v11 = vpop.f32.mrf.mxu1 }
 0x46f   : > { %1911 = vpow2.f32 %v1547_v8  ;;  %v1546_v12 = vmul.f32 -1.442695, %v1102_v10  ;;  %v1552_v13 = vmul.f32 -1.442695, %v1132_v11 }
 0x470   : > { %1913 = vpow2.f32 %v1553_v9  ;;  %v1821_v14 = vpop.f32.mrf.mxu0  ;;  %v1830_v15 = vpop.f32.mrf.mxu1 }
 0x471   : > { %1915 = vpow2.f32 %v1546_v12  ;;  %v1549_v16 = vmul.f32 -1.442695, %v1821_v14  ;;  %v1555_v17 = vmul.f32 -1.442695, %v1830_v15 }
 0x472   : > { %1917 = vpow2.f32 %v1552_v13  ;;  %v1112_v18 = vpop.f32.mrf.mxu0  ;;  %v1142_v19 = vpop.f32.mrf.mxu1 }
 0x473   : > { %1919 = vpow2.f32 %v1549_v16  ;;  %v1554_v20 = vmul.f32 -1.442695, %v1142_v19  ;;  %v1548_v27 = vmul.f32 -1.442695, %v1112_v18 }
 0x474   : > { %v1824_v21 = vpop.f32.mrf.mxu0  ;;  %v1833_v22 = vpop.f32.mrf.mxu1  ;;  %1921 = vpow2.f32 %v1555_v17 }
 0x475   : > { %1923 = vpow2.f32 %v1554_v20  ;;  %v1551_v29 = vmul.f32 -1.442695, %v1824_v21  ;;  %v1557_v37 = vmul.f32 -1.442695, %v1833_v22 }
 0x476   : > { %v1122_v23 = vpop.f32.mrf.mxu0  ;;  %v1152_v24 = vpop.f32.mrf.mxu1 }
 0x477   : > { %v1550_v25 = vmul.f32 -1.442695, %v1122_v23  ;;  %v1556_v26 = vmul.f32 -1.442695, %v1152_v24 }
 0x478   : > { %v1836_v28 = vpop.f32.mrf.mxu1 }
 0x479   : > { %1925 = vpow2.f32 %v1550_v25  ;;  %v1559_v60 = vmul.f32 -1.442695, %v1836_v28 }
 0x47a   : > { %1927 = vpow2.f32 %v1556_v26  ;;  %v1162_v30 = vpop.f32.mrf.mxu1 }
 0x47b   : > { %v1558_v31 = vmul.f32 -1.442695, %v1162_v30  ;;  %1929 = vpow2.f32 %v1548_v27 }
 0x47c   : > { %v1912_v32 = vpop.eup %1911  ;;  %v1839_v55 = vpop.f32.mrf.mxu1 }
 0x47d   : > { %v1914_v33 = vpop.eup %1913  ;;  %v1230_v34 = vadd.f32 1.0, %v1912_v32  ;;  %1931 = vpow2.f32 %v1558_v31  ;;  %v1561_v6 = vmul.f32 -1.442695, %v1839_v55 }
 0x47e   : > { %v1916_v35 = vpop.eup %1915  ;;  %v1236_v36 = vadd.f32 1.0, %v1914_v33  ;;  %1933 = vpow2.f32 %v1551_v29  ;;  %v1172_v2 = vpop.f32.mrf.mxu1 }
 0x47f   : > { %v1918_v39 = vpop.eup %1917  ;;  %1935 = vrcp.f32 %v1230_v34  ;;  %v1229_v44 = vadd.f32 1.0, %v1916_v35  ;;  %v1560_v9 = vmul.f32 -1.442695, %v1172_v2  ;;  %v1978_v2 = vld [vmem:[%s2257_s17] sm:$0xff] }
 0x480   : > { %v1920_v40 = vpop.eup %1919  ;;  %1937 = vrcp.f32 %v1236_v36  ;;  %v1235_v45 = vadd.f32 1.0, %v1918_v39 }
 0x481   : > { %v1232_v49 = vadd.f32 1.0, %v1920_v40  ;;  %v1922_v50 = vpop.eup %1921  ;;  %1939 = vpow2.f32 %v1557_v37 }
 0x482   : > { %v1924_v51 = vpop.eup %1923  ;;  %1941 = vrcp.f32 %v1235_v45  ;;  %v1238_v0 = vadd.f32 1.0, %v1922_v50 }
 0x483   : > { %1943 = vrcp.f32 %v1229_v44  ;;  %v1237_v56 = vadd.f32 1.0, %v1924_v51  ;;  %v1976_v51 = vld [vmem:[%s2257_s17 + $0x38] sm:$0xff] }
 0x484   : > { %1945 = vrcp.f32 %v1232_v49  ;;  %v1975_v49 = vld [vmem:[%s2257_s17 + $0x8] sm:$0xff] }
 0x485   : > { %1947 = vrcp.f32 %v1237_v56 }
 0x486   : > { %v1926_v61 = vpop.eup %1925  ;;  %1949 = vpow2.f32 %v1559_v60 }
 0x487   : > { %v1928_v4 = vpop.eup %1927  ;;  %v1233_v5 = vadd.f32 1.0, %v1926_v61 }
 0x488   : > { %v1930_v3 = vpop.eup %1929  ;;  %v1239_v7 = vadd.f32 1.0, %v1928_v4 }
 0x489   : > { %1951 = vrcp.f32 %v1233_v5  ;;  %v1231_v12 = vadd.f32 1.0, %v1930_v3 }
 0x48a   : > { %v1932_v8 = vpop.eup %1931  ;;  %1953 = vrcp.f32 %v1238_v0 }
 0x48b   : > { %v1934_v10 = vpop.eup %1933  ;;  %1955 = vpow2.f32 %v1561_v6  ;;  %v1241_v14 = vadd.f32 1.0, %v1932_v8 }
 0x48c   : > { %v1936_v11 = vpop.eup %1935  ;;  %1957 = vrcp.f32 %v1239_v7  ;;  %v1234_v17 = vadd.f32 1.0, %v1934_v10  ;;  %v1979_v10 = vld [vmem:[%s2257_s17 + $0x40] sm:$0xff] }
 0x48d   : > { %v1938_v13 = vpop.eup %1937  ;;  %1284 = vperm.xlu0 %1909, %v1936_v11   ;;  %1959 = vpow2.f32 %v1560_v9 }
 0x48e   : > { %1314 = vperm.xlu1 %1910, %v1938_v13   ;;  %v1940_v15 = vpop.eup %1939  ;;  %1961 = vrcp.f32 %v1231_v12  ;;  %v1980_v12 = vld [vmem:[%s2257_s17 + $0x18] sm:$0xff] }
 0x48f   : > { %v1942_v16 = vpop.eup %1941  ;;  %1963 = vrcp.f32 %v1241_v14  ;;  %v1240_v21 = vadd.f32 1.0, %v1940_v15 }
 0x490   : > { %v1944_v18 = vpop.eup %1943  ;;  %1965 = vrcp.f32 %v1234_v17 }
 0x491   : > { %1309 = vperm.xlu0 %1909, %v1942_v16   ;;  %v1946_v19 = vpop.eup %1945  ;;  %1967 = vrcp.f32 %v1240_v21 }
 0x492   : > { %1279 = vperm.xlu1 %1910, %v1944_v18   ;;  %v1948_v20 = vpop.eup %1947 }
 0x493   : > { %v1950_v22 = vpop.eup %1949 }
 0x494   : > { %v1242_v25 = vadd.f32 1.0, %v1950_v22 }
 0x495   : > { %1319 = vperm.xlu0 %1909, %v1948_v20   ;;  %v1982_v20 = vld [vmem:[%s2257_s17 + $0x48] sm:$0xff] }
 0x496   : > { %v1952_v23 = vpop.eup %1951  ;;  %1294 = vperm.xlu1 %1910, %v1946_v19   ;;  %1969 = vrcp.f32 %v1242_v25 }
 0x497   : > { %v1954_v24 = vpop.eup %1953 }
 0x498   : > { %v1956_v26 = vpop.eup %1955 }
 0x499   : > { %1299 = vperm.xlu0 %1909, %v1952_v23   ;;  %v1958_v27 = vpop.eup %1957  ;;  %v1244_v29 = vadd.f32 1.0, %v1956_v26 }
 0x49a   : > { %1324 = vperm.xlu1 %1910, %v1954_v24   ;;  %v1960_v28 = vpop.eup %1959 }
 0x49b   : > { %v1243_v30 = vadd.f32 1.0, %v1960_v28  ;;  %v1962_v31 = vpop.eup %1961  ;;  %v1984_v28 = vld [vmem:[%s2257_s17 + $0x10] sm:$0xff] }
 0x49c   : > { %v1964_v32 = vpop.eup %1963 }
 0x49d   : > { %1329 = vperm.xlu0 %1909, %v1958_v27   ;;  %1971 = vrcp.f32 %v1243_v30  ;;  %v1966_v33 = vpop.eup %1965 }
 0x49e   : > { %1289 = vperm.xlu1 %1910, %v1962_v31   ;;  %1973 = vrcp.f32 %v1244_v29  ;;  %v1968_v34 = vpop.eup %1967 }
 0x4a1   : > { %1339 = vperm.xlu0 %1909, %v1964_v32  }
 0x4a2   : > { %1304 = vperm.xlu1 %1910, %v1966_v33  }
 0x4a3   : > { %v1970_v35 = vpop.eup %1969 }
 0x4a6   : > { %1334 = vperm.xlu1 %1910, %v1968_v34  }
 0x4aa   : > { %1344 = vperm.xlu1 %1910, %v1970_v35   ;;  %v1972_v36 = vpop.eup %1971 }
 0x4ab   : > { %1349 = vperm.xlu0 %1909, %v1972_v36   ;;  %v1974_v37 = vpop.eup %1973  ;;  %v1986_v36 = vld [vmem:[%s2257_s17 + $0x28] sm:$0xff] }
 0x4ae   : > { %1354 = vperm.xlu1 %1910, %v1974_v37  }
 0x508   : > { %v1285_v39 = vpop.permute.xlu0 %1284 }
 0x509   : > { %v1315_v40 = vpop.permute.xlu1 %1314  ;;  %v1358_v44 = vmul.f32 %v1285_v39, %v2472_v62 }
 0x50a   : > { %v1364_v45 = vmul.f32 %v1315_v40, %v2454_v52  ;;  %v1977_v52 = vld [vmem:[%s2257_s17 + $0x30] sm:$0xff] }
 0x50b   : > { %v1374_v50 = vadd.f32 %v1975_v49, %v1358_v44 }
 0x50c   : > { %v1380_v55 = vadd.f32 %v1976_v51, %v1364_v45  ;;  %v1310_v56 = vpop.permute.xlu0 %1309 }
 0x50d   : > { %v1390_v60 = vmax.f32 %v1374_v50, 0.0  ;;  %v1363_v61 = vmul.f32 %v1310_v56, %v2463_v57  ;;  %v1280_v0 = vpop.permute.xlu1 %1279 }
 0x50e   : > { %v1396_v4 = vmax.f32 %v1380_v55, 0.0  ;;  %v1357_v5 = vmul.f32 %v1280_v0, %v2480_v1  ;;  %v1989_v0 = vld [vmem:[%s2257_s17 + $0x70] sm:$0xff] }
 0x50f   : > { %1406 = vst [vmem:[%s2572_s18 + $0x8] sm:$0xff] %v1390_v60  ;;  %v1379_v62 = vadd.f32 %v1977_v52, %v1363_v61  ;;  %v1988_v60 = vld [vmem:[%s2257_s17 + $0x68] sm:$0xff] }
 0x510   : > { %1412 = vst [vmem:[%s2572_s18 + $0x38] sm:$0xff] %v1396_v4  ;;  %v1373_v6 = vadd.f32 %v1978_v2, %v1357_v5  ;;  %v1320_v3 = vpop.permute.xlu0 %1319 }
 0x511   : > { %v1395_v57 = vmax.f32 %v1379_v62, 0.0  ;;  %v1365_v7 = vmul.f32 %v1320_v3, %v2457_v53  ;;  %v1295_v8 = vpop.permute.xlu1 %1294 }
 0x512   : > { %v1389_v1 = vmax.f32 %v1373_v6, 0.0  ;;  %v1360_v9 = vmul.f32 %v1295_v8, %v2466_v58  ;;  %v1981_v58 = vld [vmem:[%s2257_s17 + $0x20] sm:$0xff] }
 0x513   : > { %1411 = vst [vmem:[%s2572_s18 + $0x30] sm:$0xff] %v1395_v57  ;;  %v1381_v11 = vadd.f32 %v1979_v10, %v1365_v7 }
 0x514   : > { %1405 = vst [vmem:[%s2572_s18] sm:$0xff] %v1389_v1  ;;  %v1376_v13 = vadd.f32 %v1980_v12, %v1360_v9  ;;  %v1300_v14 = vpop.permute.xlu0 %1299 }
 0x515   : > { %v1397_v15 = vmax.f32 %v1381_v11, 0.0  ;;  %v1325_v16 = vpop.permute.xlu1 %1324  ;;  %v1361_v53 = vmul.f32 %v1300_v14, %v2469_v59 }
 0x516   : > { %v1392_v17 = vmax.f32 %v1376_v13, 0.0  ;;  %v1366_v18 = vmul.f32 %v1325_v16, %v2447_v47  ;;  %v1983_v47 = vld [vmem:[%s2257_s17 + $0x50] sm:$0xff] }
 0x517   : > { %1413 = vst [vmem:[%s2572_s18 + $0x40] sm:$0xff] %v1397_v15  ;;  %v1377_v19 = vadd.f32 %v1981_v58, %v1361_v53 }
 0x518   : > { %1408 = vst [vmem:[%s2572_s18 + $0x18] sm:$0xff] %v1392_v17  ;;  %v1382_v21 = vadd.f32 %v1982_v20, %v1366_v18  ;;  %v1330_v22 = vpop.permute.xlu0 %1329 }
 0x519   : > { %v1393_v23 = vmax.f32 %v1377_v19, 0.0  ;;  %v1290_v24 = vpop.permute.xlu1 %1289  ;;  %v1367_v25 = vmul.f32 %v1330_v22, %v2450_v48 }
 0x51a   : > { %v1398_v59 = vmax.f32 %v1382_v21, 0.0  ;;  %v1359_v26 = vmul.f32 %v1290_v24, %v2475_v63  ;;  %v1985_v63 = vld [vmem:[%s2257_s17 + $0x60] sm:$0xff] }
 0x51b   : > { %1409 = vst [vmem:[%s2572_s18 + $0x20] sm:$0xff] %v1393_v23  ;;  %v1383_v27 = vadd.f32 %v1983_v47, %v1367_v25 }
 0x51c   : > { %1414 = vst [vmem:[%s2572_s18 + $0x48] sm:$0xff] %v1398_v59  ;;  %v1375_v29 = vadd.f32 %v1984_v28, %v1359_v26  ;;  %v1340_v30 = vpop.permute.xlu0 %1339 }
 0x51d   : > { %v1399_v31 = vmax.f32 %v1383_v27, 0.0  ;;  %v1305_v32 = vpop.permute.xlu1 %1304  ;;  %v1369_v48 = vmul.f32 %v1340_v30, %v2444_v46  ;;  %v1987_v46 = vld [vmem:[%s2257_s17 + $0x58] sm:$0xff] }
 0x51e   : > { %v1391_v33 = vmax.f32 %v1375_v29, 0.0  ;;  %v1362_v34 = vmul.f32 %v1305_v32, %v2460_v54 }
 0x51f   : > { %1415 = vst [vmem:[%s2572_s18 + $0x50] sm:$0xff] %v1399_v31  ;;  %v1385_v35 = vadd.f32 %v1985_v63, %v1369_v48 }
 0x520   : > { %1407 = vst [vmem:[%s2572_s18 + $0x10] sm:$0xff] %v1391_v33  ;;  %v1378_v37 = vadd.f32 %v1986_v36, %v1362_v34 }
 0x521   : > { %v1401_v39 = vmax.f32 %v1385_v35, 0.0  ;;  %v1335_v40 = vpop.permute.xlu1 %1334 }
 0x522   : > { %v1394_v44 = vmax.f32 %v1378_v37, 0.0  ;;  %v1368_v45 = vmul.f32 %v1335_v40, %v2441_v43 }
 0x523   : > { %1417 = vst [vmem:[%s2572_s18 + $0x60] sm:$0xff] %v1401_v39 }
 0x524   : > { %1410 = vst [vmem:[%s2572_s18 + $0x28] sm:$0xff] %v1394_v44  ;;  %v1384_v54 = vadd.f32 %v1987_v46, %v1368_v45 }
 0x525   : > { %v1345_v49 = vpop.permute.xlu1 %1344 }
 0x526   : > { %v1400_v50 = vmax.f32 %v1384_v54, 0.0  ;;  %v1370_v51 = vmul.f32 %v1345_v49, %v2438_v42  ;;  %v1350_v55 = vpop.permute.xlu0 %1349  ;;  %v1990_v42 = vld [vmem:[%s2257_s17 + $0x78] sm:$0xff]  ;;  %s2120_s17 = smov [#allocation7]  }
 0x527   : > { %v1371_v56 = vmul.f32 %v1350_v55, %v2435_v41  ;;  %s2047_s8 = sshll.u32 %s2120_s17, 4  ;;  %s2048_s8 = int_to_ptr.vmem [resolvable:$false] %s2047_s8 }
 0x528   : > { %1416 = vst [vmem:[%s2572_s18 + $0x58] sm:$0xff] %v1400_v50  ;;  %v1386_v61 = vadd.f32 %v1988_v60, %v1370_v51  ;;  %s2049_s9 = scalar_lea.vmem %s2048_s8, 4096  ;;  %p2050_p11 = scmp.lt.s32.totalorder %s2621_s20, %s2048_s8 }
 0x529   : > { %v1355_v43 = vpop.permute.xlu1 %1354  ;;  %v1387_v4 = vadd.f32 %v1989_v0, %v1371_v56  ;;  %p2051_p0 = scmp.lt.s32.totalorder %s2049_s9, %s2043_s29 }
 0x52a   : > { %v1402_v5 = vmax.f32 %v1386_v61, 0.0  ;;  %v1372_v52 = vmul.f32 %v1355_v43, %v2433_v38 }
 0x52b   : > { %v1403_v62 = vmax.f32 %v1387_v4, 0.0  ;;  %p2052_p1 = por %p2051_p0, %p2050_p11 }
 0x52c   : > { %1418 = vst [vmem:[%s2572_s18 + $0x68] sm:$0xff] %v1402_v5  ;;  %v1388_v2 = vadd.f32 %v1990_v42, %v1372_v52 }
 0x52d   : > { %1419 = vst [vmem:[%s2572_s18 + $0x70] sm:$0xff] %v1403_v62  ;;  %p2053_p3 = pnand %p2052_p1, %p2046_p8 }
 0x52e   : > { %v1404_v41 = vmax.f32 %v1388_v2, 0.0 }
 0x530   : > { %1420 = vst [vmem:[%s2572_s18 + $0x78] sm:$0xff] %v1404_v41 }
 0x531   : > { %2056 = shalt.err (!%p2053_p3)
}
 0x532   : > { %s2057_s13 = scalar_lea.hbm %s2619_s23, 2048  ;;  %s2061_s16 = scalar_lea.hbm %s2674_s7, 4096 }
 0x533   : > { %p2058_p2 = scmp.ne.s32.totalorder %s2619_s23, %s2057_s13  ;;  %p2062_p7 = scmp.lt.s32.totalorder %s2619_s23, %s2674_s7 }
 0x534   : > { %p2063_p6 = scmp.lt.s32.totalorder %s2061_s16, %s2057_s13 }
 0x535   : > { %p2059_p4 = pnand %p2058_p2, %p2201_p5 }
 0x536   : > { %p2064_p9 = por %p2063_p6, %p2062_p7 }
 0x537   : > { %p2060_p13 = pneg %p2059_p4 }
 0x539   : > { %p2065_p10 = pnand %p2064_p9, %p2060_p13 }
 0x53b   : > { %2068 = shalt.err (!%p2065_p10)
}
 0x53c   : > { %s2121_s21 = smov 128   ;;  %s2122_s22 = smov 8  }
 0x53d   : > { %1850 = dma.vmem_to_hbm [thread:$0]  (%p2201_p5), %s2621_s20, 2048, %s2619_s23, %s2627_s28, %s2121_s21, %s2121_s21, %s2122_s22  }
 0x53e PF: > { %p1867_p12 = scmp.ge.s32.totalorder %s2111_s27, 2  ;;  %s1450_s29 = sand.u32 1, %s2099_s24  }
 0x53f   : > { %p2684_p8 = scmp.ne.s32.totalorder %s2677_s12, 0  ;;  %s1451_s17 = scalar_lea.sflag [#allocation4], %s1450_s29 }
 0x541   : > { %p1860_p11 = pnand %p1867_p12, %p2684_p8 }
 0x543   : > { %p1861_p0 = pneg %p1860_p11 }
 0x545   : > { %2094 = dma.done.wait (%p1861_p0), %s1451_s17, 2048  }
 0x546   : > { %2096 = vsyncadd (%p1861_p0), %s1451_s17, 4294965248  ;;  %p19_p1 = scmp.ge.s32.totalorder %s2188_s30, 4   ;;  %s2685_s24 = smov %s2103_s25 }
 0x547   : > { %s2686_s25 = smov %s2107_s26  ;;  %s2687_s26 = smov %s2199_s10 }
 0x548   : > { %s2688_s27 = smov %s2188_s30  ;;  %21 = sbr.rel (!%p19_p1) target bundleno = 5 (0x5), region = 92 }
 0x54d   :  { %1456 = vsyncpa [#allocation3], 1 }
 0x54e   :  { %1458 = vsyncpa [#allocation3 + $0x1], 1 }
 0x54f   :  { %1459 = vsyncpa [#allocation6], 1 }
 0x550   :  { %1460 = vsyncpa [#allocation4], 1 }
 0x551   :  { %1462 = vsyncpa [#allocation4 + $0x1], 1 }

</bundles_post_ra>
